<compile_context>
chip_gen: v7x
topology: tpu7x:2x2x1
jax: 0.10.0
libtpu: 0.0.40
codegen_flags: <defaults>
</compile_context>

<pallas_src>
import functools

import jax
import jax.numpy as jnp
from jax.experimental import pallas as pl
from jax.experimental.pallas import tpu as pltpu


def _tensorcores_per_chip():
    """Best-effort detection of dual-TensorCore chips (v4 / v5p / v7x)."""
    try:
        kind = jax.devices()[0].device_kind.lower()
    except Exception:
        return 1
    if any(tag in kind for tag in ("v4", "v5p", "v7")):
        return 2
    return 1


def _attention_kernel(x_ref, g_ref, b_ref, wqkv_ref, wo_ref, bo_ref,
                      out_ref, attn_ref, *, heads, dim_head, eps):
    # x_ref     : (bb, N, D)          f32/bf16 activations
    # g_ref     : (1, D)              f32   LayerNorm gamma
    # b_ref     : (1, D)              f32   LayerNorm beta
    # wqkv_ref  : (D, 3*inner)        bf16  head-major fused [q0*s|k0|v0|q1*s|k1|v1|...]
    # wo_ref    : (inner, D)          bf16
    # bo_ref    : (1, D)              f32
    # out_ref   : (bb, N, D)
    # attn_ref  : (bb, N, heads*N)    f32   (lane-dense; host reshapes to (B,H,N,N))
    bb, N, D = x_ref.shape
    inner = heads * dim_head
    cdt = wqkv_ref.dtype  # bf16 MXU compute dtype

    # Stack batches so every matmul sees bb*N rows (better MXU fill, one step).
    x = x_ref[...].astype(jnp.float32).reshape(bb * N, D)

    # ---- LayerNorm (f32, biased variance, eps inside rsqrt, affine) ----
    mean = jnp.mean(x, axis=-1, keepdims=True)
    xc = x - mean
    var = jnp.mean(xc * xc, axis=-1, keepdims=True)
    xn = xc * jax.lax.rsqrt(var + eps)
    xn = xn * g_ref[...] + b_ref[...]                               # (bb*N, D)

    # ---- Fused QKV projection: ONE MXU matmul (bb*N, D) @ (D, 3*inner) ----
    qkv = jnp.dot(xn.astype(cdt), wqkv_ref[...],
                  preferred_element_type=jnp.float32)               # (bb*N, 3*inner)
    qkv = qkv.reshape(bb, N, 3 * inner)

    # ---- Per-head scaled dot-product attention (scale pre-folded into Wq) ----
    attn_tiles = []
    o_tiles = []
    for h in range(heads):
        base = h * 3 * dim_head                                     # head-major block
        qh = qkv[:, :, base:base + dim_head].astype(cdt)            # (bb, N, dh)
        kh = qkv[:, :, base + dim_head:base + 2 * dim_head].astype(cdt)
        vh = qkv[:, :, base + 2 * dim_head:base + 3 * dim_head].astype(cdt)

        # Batched q @ k^T (no materialized transpose).
        dots = jnp.einsum("bnd,bmd->bnm", qh, kh,
                          preferred_element_type=jnp.float32)       # (bb, N, N)
        dots = dots - jnp.max(dots, axis=-1, keepdims=True)
        p = jnp.exp(dots)
        inv = pl.reciprocal(jnp.sum(p, axis=-1, keepdims=True))     # exact, once
        attn_h = p * inv                                            # (bb, N, N) f32
        attn_tiles.append(attn_h)

        # attn @ v with the SAME normalized matrix (consistent with stored attn).
        o_tiles.append(jnp.einsum("bnm,bmd->bnd", attn_h.astype(cdt), vh,
                                  preferred_element_type=jnp.float32))

    # ---- One lane-dense attention store: (bb, N, heads*N) ----
    attn_ref[...] = jnp.concatenate(attn_tiles, axis=-1).astype(attn_ref.dtype)

    # ---- Reassemble head outputs in vregs, single output projection ----
    o = jnp.concatenate(o_tiles, axis=-1).reshape(bb * N, inner)    # (bb*N, inner)
    out = jnp.dot(o.astype(cdt), wo_ref[...],
                  preferred_element_type=jnp.float32) + bo_ref[...]
    out_ref[...] = out.reshape(bb, N, D).astype(out_ref.dtype)


def attention_forward(x, gamma, beta, w_qkv, wo, bo, *, heads, dim_head,
                      compute_dtype=jnp.bfloat16):
    B, N, D = x.shape
    inner = heads * dim_head
    assert w_qkv.shape == (D, 3 * inner)
    assert wo.shape == (inner, D)
    scale = dim_head ** (-0.5)

    # ---- Host-side weight prep (one-time, free) ----
    # Fold the softmax scale into Wq and reorder columns head-major interleaved:
    # [q0*s | k0 | v0 | q1*s | k1 | v1 | ...] so each head reads one contiguous
    # lane block of the fused qkv result.
    wq = w_qkv[:, :inner] * scale
    wk = w_qkv[:, inner:2 * inner]
    wv = w_qkv[:, 2 * inner:]
    blocks = []
    for h in range(heads):
        s = h * dim_head
        blocks += [wq[:, s:s + dim_head], wk[:, s:s + dim_head], wv[:, s:s + dim_head]]
    w_qkv_f = jnp.concatenate(blocks, axis=1).astype(compute_dtype)
    wo_c = wo.astype(compute_dtype)
    gamma2 = gamma.reshape(1, D).astype(jnp.float32)
    beta2 = beta.reshape(1, D).astype(jnp.float32)
    bo2 = bo.reshape(1, D).astype(jnp.float32)

    # ---- Grid strategy: single step on single-TC chips, per-batch on dual-TC ----
    num_tc = _tensorcores_per_chip()
    if num_tc > 1 and B > 1:
        bb = 1                                  # one batch per step -> both TCs busy
        semantics = ("parallel",)
    else:
        bb = B                                  # single-TC: avoid per-step overhead
        semantics = ("arbitrary",)
    grid = (B // bb,)
    # TODO(synk): if B == 1 on a dual-TC chip, add heads (or query blocks) as a
    # second "parallel" grid axis so the second TensorCore is not idle.

    kernel = functools.partial(_attention_kernel, heads=heads,
                               dim_head=dim_head, eps=1e-5)

    cost = pl.CostEstimate(
        flops=2 * B * N * (D * 3 * inner + heads * 2 * N * dim_head + inner * D),
        transcendentals=B * heads * N * N,
        bytes_accessed=(x.size * x.dtype.itemsize
                        + w_qkv_f.size * 2 + wo_c.size * 2
                        + (gamma2.size + beta2.size + bo2.size) * 4
                        + B * N * D * x.dtype.itemsize
                        + B * N * heads * N * 4),
    )

    grid_spec = pltpu.PrefetchScalarGridSpec(
        num_scalar_prefetch=0,
        grid=grid,
        in_specs=[
            pl.BlockSpec((bb, N, D), lambda b: (b, 0, 0)),              # x
            pl.BlockSpec((1, D), lambda b: (0, 0)),                     # gamma
            pl.BlockSpec((1, D), lambda b: (0, 0)),                     # beta
            pl.BlockSpec((D, 3 * inner), lambda b: (0, 0)),             # W_qkv fused
            pl.BlockSpec((inner, D), lambda b: (0, 0)),                 # Wo
            pl.BlockSpec((1, D), lambda b: (0, 0)),                     # bo
        ],
        out_specs=[
            pl.BlockSpec((bb, N, D), lambda b: (b, 0, 0)),              # out
            pl.BlockSpec((bb, N, heads * N), lambda b: (b, 0, 0)),      # attn (flat)
        ],
    )

    out, attn_flat = pl.pallas_call(
        kernel,
        out_shape=(
            jax.ShapeDtypeStruct((B, N, D), x.dtype),
            jax.ShapeDtypeStruct((B, N, heads * N), jnp.float32),       # attn kept f32
        ),
        grid_spec=grid_spec,
        compiler_params=pltpu.CompilerParams(dimension_semantics=semantics),
        cost_estimate=cost,
    )(x, gamma2, beta2, w_qkv_f, wo_c, bo2)

    # Host-side layout plumbing back to the module's (B, heads, N, N).
    attn = attn_flat.reshape(B, N, heads, N).transpose(0, 2, 1, 3)
    return out, attn


def attention_reference(x, gamma, beta, w_qkv, wo, bo, *, heads, dim_head):
    """Pure-JAX f32 reference matching the PyTorch module semantics."""
    B, N, D = x.shape
    inner = heads * dim_head
    scale = dim_head ** (-0.5)
    mean = jnp.mean(x, axis=-1, keepdims=True)
    var = jnp.mean((x - mean) ** 2, axis=-1, keepdims=True)
    xn = (x - mean) / jnp.sqrt(var + 1e-5) * gamma + beta
    qkv = xn @ w_qkv
    q, k, v = qkv[..., :inner], qkv[..., inner:2 * inner], qkv[..., 2 * inner:]

    def split_heads(t):  # 'b n (h d) -> b h n d'
        return t.reshape(B, N, heads, dim_head).transpose(0, 2, 1, 3)

    q, k, v = split_heads(q), split_heads(k), split_heads(v)
    dots = jnp.einsum("bhnd,bhmd->bhnm", q, k) * scale
    attn = jax.nn.softmax(dots, axis=-1)
    o = jnp.einsum("bhnm,bhmd->bhnd", attn, v)
    o = o.transpose(0, 2, 1, 3).reshape(B, N, inner)
    return o @ wo + bo, attn


if __name__ == "__main__":
    # Small shapes consistent with the module: dim=32, heads=4, dim_head=16.
    B, N, D = 2, 8, 32
    heads, dim_head = 4, 16
    inner = heads * dim_head

    key = jax.random.PRNGKey(0)
    kx, kg, kb, kqkv, kwo, kbo = jax.random.split(key, 6)

    x = jax.random.normal(kx, (B, N, D), dtype=jnp.float32)
    gamma = 1.0 + 0.1 * jax.random.normal(kg, (D,), dtype=jnp.float32)
    beta = 0.1 * jax.random.normal(kb, (D,), dtype=jnp.float32)

    # to_qkv: Linear(dim, 3*inner, bias=False) stored here as (D, 3*inner).
    w_qkv = 0.1 * jax.random.normal(kqkv, (D, 3 * inner), dtype=jnp.float32)
    # to_out: Linear(inner, dim) with bias (project_out is True here).
    wo = 0.1 * jax.random.normal(kwo, (inner, D), dtype=jnp.float32)
    bo = 0.1 * jax.random.normal(kbo, (D,), dtype=jnp.float32)

    out, attn = attention_forward(x, gamma, beta, w_qkv, wo, bo,
                                  heads=heads, dim_head=dim_head)
    jax.block_until_ready((out, attn))

    ref_out, ref_attn = attention_reference(x, gamma, beta, w_qkv, wo, bo,
                                            heads=heads, dim_head=dim_head)
    assert out.shape == (B, N, D) and attn.shape == (B, heads, N, N)
    # Kernel feeds the MXU bf16 operands (f32 accumulation), so tolerances vs.
    # the pure-f32 reference are set accordingly.
    assert jnp.allclose(out, ref_out, atol=2e-2, rtol=2e-2), (
        float(jnp.max(jnp.abs(out - ref_out))))
    assert jnp.allclose(attn, ref_attn, atol=1e-2, rtol=2e-2), (
        float(jnp.max(jnp.abs(attn - ref_attn))))

    print("KERNEL_OK")
</pallas_src>

<mosaic_0001>
module attributes {stable_mosaic.version = 11 : i64} {
  func.func @_attention_kernel(%arg0: i32, %arg1: memref<2x8x32xf32, #tpu.memory_space<vmem>>, %arg2: memref<1x32xf32, #tpu.memory_space<vmem>>, %arg3: memref<1x32xf32, #tpu.memory_space<vmem>>, %arg4: memref<32x192xbf16, #tpu.memory_space<vmem>>, %arg5: memref<64x32xbf16, #tpu.memory_space<vmem>>, %arg6: memref<1x32xf32, #tpu.memory_space<vmem>>, %arg7: memref<2x8x32xf32, #tpu.memory_space<vmem>>, %arg8: memref<2x8x32xf32, #tpu.memory_space<vmem>>) attributes {dimension_semantics = [#tpu.dimension_semantics<arbitrary>], iteration_bounds = array<i64: 1>, scalar_prefetch = 0 : i64, scratch_operands = 0 : i64, tpu.core_type = #tpu.core_type<tc>, window_params = [{transform_indices = @transform_0, window_bounds = array<i64: 2, 8, 32>}, {pipeline_mode = #tpu.pipeline_mode<synchronous>, transform_indices = @transform_1, window_bounds = array<i64: 1, 32>}, {pipeline_mode = #tpu.pipeline_mode<synchronous>, transform_indices = @transform_2, window_bounds = array<i64: 1, 32>}, {pipeline_mode = #tpu.pipeline_mode<synchronous>, transform_indices = @transform_3, window_bounds = array<i64: 32, 192>}, {pipeline_mode = #tpu.pipeline_mode<synchronous>, transform_indices = @transform_4, window_bounds = array<i64: 64, 32>}, {pipeline_mode = #tpu.pipeline_mode<synchronous>, transform_indices = @transform_5, window_bounds = array<i64: 1, 32>}, {transform_indices = @transform_6, window_bounds = array<i64: 2, 8, 32>}, {transform_indices = @transform_7, window_bounds = array<i64: 2, 8, 32>}]} {
    %c0 = arith.constant 0 : index
    %c0_0 = arith.constant 0 : index
    %c0_1 = arith.constant 0 : index
    %0 = vector.load %arg1[%c0, %c0_0, %c0_1] : memref<2x8x32xf32, #tpu.memory_space<vmem>>, vector<2x8x32xf32>
    %1 = vector.shape_cast %0 : vector<2x8x32xf32> to vector<16x32xf32>
    %cst = arith.constant dense<0.000000e+00> : vector<16xf32>
    %2 = vector.multi_reduction <add>, %1, %cst [1] : vector<16x32xf32> to vector<16xf32>
    %3 = vector.shape_cast %2 : vector<16xf32> to vector<16x1xf32>
    %cst_2 = arith.constant 3.200000e+01 : f32
    %4 = vector.broadcast %cst_2 : f32 to vector<16x1xf32>
    %5 = arith.divf %3, %4 : vector<16x1xf32>
    %6 = vector.broadcast %5 : vector<16x1xf32> to vector<16x32xf32>
    %7 = arith.subf %1, %6 : vector<16x32xf32>
    %8 = arith.mulf %7, %7 : vector<16x32xf32>
    %cst_3 = arith.constant dense<0.000000e+00> : vector<16xf32>
    %9 = vector.multi_reduction <add>, %8, %cst_3 [1] : vector<16x32xf32> to vector<16xf32>
    %10 = vector.shape_cast %9 : vector<16xf32> to vector<16x1xf32>
    %cst_4 = arith.constant 3.200000e+01 : f32
    %11 = vector.broadcast %cst_4 : f32 to vector<16x1xf32>
    %12 = arith.divf %10, %11 : vector<16x1xf32>
    %cst_5 = arith.constant 9.99999974E-6 : f32
    %13 = vector.broadcast %cst_5 : f32 to vector<16x1xf32>
    %14 = arith.addf %12, %13 : vector<16x1xf32>
    %15 = math.rsqrt %14 : vector<16x1xf32>
    %16 = vector.broadcast %15 : vector<16x1xf32> to vector<16x32xf32>
    %17 = arith.mulf %7, %16 : vector<16x32xf32>
    %c0_6 = arith.constant 0 : index
    %c0_7 = arith.constant 0 : index
    %18 = vector.load %arg2[%c0_6, %c0_7] : memref<1x32xf32, #tpu.memory_space<vmem>>, vector<1x32xf32>
    %19 = vector.broadcast %18 : vector<1x32xf32> to vector<16x32xf32>
    %20 = arith.mulf %17, %19 : vector<16x32xf32>
    %c0_8 = arith.constant 0 : index
    %c0_9 = arith.constant 0 : index
    %21 = vector.load %arg3[%c0_8, %c0_9] : memref<1x32xf32, #tpu.memory_space<vmem>>, vector<1x32xf32>
    %22 = vector.broadcast %21 : vector<1x32xf32> to vector<16x32xf32>
    %23 = arith.addf %20, %22 : vector<16x32xf32>
    %24 = arith.truncf %23 : vector<16x32xf32> to vector<16x32xbf16>
    %c0_10 = arith.constant 0 : index
    %c0_11 = arith.constant 0 : index
    %25 = vector.load %arg4[%c0_10, %c0_11] : memref<32x192xbf16, #tpu.memory_space<vmem>>, vector<32x192xbf16>
    %cst_12 = arith.constant dense<0.000000e+00> : vector<16x192xf32>
    %26 = tpu.matmul %24, %25, %cst_12 {dimension_numbers = #tpu.dot_dimension_numbers<[1], [0], [0], [1], [0, 0, 1, 1], [], []>} : vector<16x32xbf16>, vector<32x192xbf16>, vector<16x192xf32> -> vector<16x192xf32>
    %27 = vector.shape_cast %26 : vector<16x192xf32> to vector<2x8x192xf32>
    %28 = vector.extract_strided_slice %27 {offsets = [0, 0, 0], sizes = [2, 8, 16], strides = [1, 1, 1]} : vector<2x8x192xf32> to vector<2x8x16xf32>
    %29 = arith.truncf %28 : vector<2x8x16xf32> to vector<2x8x16xbf16>
    %30 = vector.extract_strided_slice %27 {offsets = [0, 0, 16], sizes = [2, 8, 16], strides = [1, 1, 1]} : vector<2x8x192xf32> to vector<2x8x16xf32>
    %31 = arith.truncf %30 : vector<2x8x16xf32> to vector<2x8x16xbf16>
    %32 = vector.extract_strided_slice %27 {offsets = [0, 0, 32], sizes = [2, 8, 16], strides = [1, 1, 1]} : vector<2x8x192xf32> to vector<2x8x16xf32>
    %33 = arith.truncf %32 : vector<2x8x16xf32> to vector<2x8x16xbf16>
    "tpu.trace_start"() <{level = 10 : i32, message = "bnd,bmd->bnm"}> : () -> ()
    %cst_13 = arith.constant dense<0.000000e+00> : vector<2x8x8xf32>
    %34 = tpu.matmul %29, %31, %cst_13 {dimension_numbers = #tpu.dot_dimension_numbers<[2], [2], [1], [1], [0, 0, 0, 1, 1, 1], [0], [0]>} : vector<2x8x16xbf16>, vector<2x8x16xbf16>, vector<2x8x8xf32> -> vector<2x8x8xf32>
    "tpu.trace_stop"() : () -> ()
    %cst_14 = arith.constant dense<0xFF800000> : vector<2x8xf32>
    %35 = vector.multi_reduction <maximumf>, %34, %cst_14 [2] : vector<2x8x8xf32> to vector<2x8xf32>
    %36 = vector.shape_cast %35 : vector<2x8xf32> to vector<2x8x1xf32>
    %37 = vector.broadcast %36 : vector<2x8x1xf32> to vector<2x8x8xf32>
    %38 = arith.subf %34, %37 : vector<2x8x8xf32>
    %39 = math.exp %38 : vector<2x8x8xf32>
    %cst_15 = arith.constant dense<0.000000e+00> : vector<2x8xf32>
    %40 = vector.multi_reduction <add>, %39, %cst_15 [2] : vector<2x8x8xf32> to vector<2x8xf32>
    %41 = vector.shape_cast %40 : vector<2x8xf32> to vector<2x8x1xf32>
    %42 = tpu.reciprocal %41 : vector<2x8x1xf32> -> vector<2x8x1xf32>
    %43 = vector.broadcast %42 : vector<2x8x1xf32> to vector<2x8x8xf32>
    %44 = arith.mulf %39, %43 : vector<2x8x8xf32>
    %45 = arith.truncf %44 : vector<2x8x8xf32> to vector<2x8x8xbf16>
    "tpu.trace_start"() <{level = 10 : i32, message = "bnm,bmd->bnd"}> : () -> ()
    %cst_16 = arith.constant dense<0.000000e+00> : vector<2x8x16xf32>
    %46 = tpu.matmul %45, %33, %cst_16 {dimension_numbers = #tpu.dot_dimension_numbers<[2], [1], [1], [2], [0, 0, 0, 1, 1, 2], [0], [0]>} : vector<2x8x8xbf16>, vector<2x8x16xbf16>, vector<2x8x16xf32> -> vector<2x8x16xf32>
    "tpu.trace_stop"() : () -> ()
    %47 = vector.extract_strided_slice %27 {offsets = [0, 0, 48], sizes = [2, 8, 16], strides = [1, 1, 1]} : vector<2x8x192xf32> to vector<2x8x16xf32>
    %48 = arith.truncf %47 : vector<2x8x16xf32> to vector<2x8x16xbf16>
    %49 = vector.extract_strided_slice %27 {offsets = [0, 0, 64], sizes = [2, 8, 16], strides = [1, 1, 1]} : vector<2x8x192xf32> to vector<2x8x16xf32>
    %50 = arith.truncf %49 : vector<2x8x16xf32> to vector<2x8x16xbf16>
    %51 = vector.extract_strided_slice %27 {offsets = [0, 0, 80], sizes = [2, 8, 16], strides = [1, 1, 1]} : vector<2x8x192xf32> to vector<2x8x16xf32>
    %52 = arith.truncf %51 : vector<2x8x16xf32> to vector<2x8x16xbf16>
    "tpu.trace_start"() <{level = 10 : i32, message = "bnd,bmd->bnm"}> : () -> ()
    %cst_17 = arith.constant dense<0.000000e+00> : vector<2x8x8xf32>
    %53 = tpu.matmul %48, %50, %cst_17 {dimension_numbers = #tpu.dot_dimension_numbers<[2], [2], [1], [1], [0, 0, 0, 1, 1, 1], [0], [0]>} : vector<2x8x16xbf16>, vector<2x8x16xbf16>, vector<2x8x8xf32> -> vector<2x8x8xf32>
    "tpu.trace_stop"() : () -> ()
    %cst_18 = arith.constant dense<0xFF800000> : vector<2x8xf32>
    %54 = vector.multi_reduction <maximumf>, %53, %cst_18 [2] : vector<2x8x8xf32> to vector<2x8xf32>
    %55 = vector.shape_cast %54 : vector<2x8xf32> to vector<2x8x1xf32>
    %56 = vector.broadcast %55 : vector<2x8x1xf32> to vector<2x8x8xf32>
    %57 = arith.subf %53, %56 : vector<2x8x8xf32>
    %58 = math.exp %57 : vector<2x8x8xf32>
    %cst_19 = arith.constant dense<0.000000e+00> : vector<2x8xf32>
    %59 = vector.multi_reduction <add>, %58, %cst_19 [2] : vector<2x8x8xf32> to vector<2x8xf32>
    %60 = vector.shape_cast %59 : vector<2x8xf32> to vector<2x8x1xf32>
    %61 = tpu.reciprocal %60 : vector<2x8x1xf32> -> vector<2x8x1xf32>
    %62 = vector.broadcast %61 : vector<2x8x1xf32> to vector<2x8x8xf32>
    %63 = arith.mulf %58, %62 : vector<2x8x8xf32>
    %64 = arith.truncf %63 : vector<2x8x8xf32> to vector<2x8x8xbf16>
    "tpu.trace_start"() <{level = 10 : i32, message = "bnm,bmd->bnd"}> : () -> ()
    %cst_20 = arith.constant dense<0.000000e+00> : vector<2x8x16xf32>
    %65 = tpu.matmul %64, %52, %cst_20 {dimension_numbers = #tpu.dot_dimension_numbers<[2], [1], [1], [2], [0, 0, 0, 1, 1, 2], [0], [0]>} : vector<2x8x8xbf16>, vector<2x8x16xbf16>, vector<2x8x16xf32> -> vector<2x8x16xf32>
    "tpu.trace_stop"() : () -> ()
    %66 = vector.extract_strided_slice %27 {offsets = [0, 0, 96], sizes = [2, 8, 16], strides = [1, 1, 1]} : vector<2x8x192xf32> to vector<2x8x16xf32>
    %67 = arith.truncf %66 : vector<2x8x16xf32> to vector<2x8x16xbf16>
    %68 = vector.extract_strided_slice %27 {offsets = [0, 0, 112], sizes = [2, 8, 16], strides = [1, 1, 1]} : vector<2x8x192xf32> to vector<2x8x16xf32>
    %69 = arith.truncf %68 : vector<2x8x16xf32> to vector<2x8x16xbf16>
    %70 = vector.extract_strided_slice %27 {offsets = [0, 0, 128], sizes = [2, 8, 16], strides = [1, 1, 1]} : vector<2x8x192xf32> to vector<2x8x16xf32>
    %71 = arith.truncf %70 : vector<2x8x16xf32> to vector<2x8x16xbf16>
    "tpu.trace_start"() <{level = 10 : i32, message = "bnd,bmd->bnm"}> : () -> ()
    %cst_21 = arith.constant dense<0.000000e+00> : vector<2x8x8xf32>
    %72 = tpu.matmul %67, %69, %cst_21 {dimension_numbers = #tpu.dot_dimension_numbers<[2], [2], [1], [1], [0, 0, 0, 1, 1, 1], [0], [0]>} : vector<2x8x16xbf16>, vector<2x8x16xbf16>, vector<2x8x8xf32> -> vector<2x8x8xf32>
    "tpu.trace_stop"() : () -> ()
    %cst_22 = arith.constant dense<0xFF800000> : vector<2x8xf32>
    %73 = vector.multi_reduction <maximumf>, %72, %cst_22 [2] : vector<2x8x8xf32> to vector<2x8xf32>
    %74 = vector.shape_cast %73 : vector<2x8xf32> to vector<2x8x1xf32>
    %75 = vector.broadcast %74 : vector<2x8x1xf32> to vector<2x8x8xf32>
    %76 = arith.subf %72, %75 : vector<2x8x8xf32>
    %77 = math.exp %76 : vector<2x8x8xf32>
    %cst_23 = arith.constant dense<0.000000e+00> : vector<2x8xf32>
    %78 = vector.multi_reduction <add>, %77, %cst_23 [2] : vector<2x8x8xf32> to vector<2x8xf32>
    %79 = vector.shape_cast %78 : vector<2x8xf32> to vector<2x8x1xf32>
    %80 = tpu.reciprocal %79 : vector<2x8x1xf32> -> vector<2x8x1xf32>
    %81 = vector.broadcast %80 : vector<2x8x1xf32> to vector<2x8x8xf32>
    %82 = arith.mulf %77, %81 : vector<2x8x8xf32>
    %83 = arith.truncf %82 : vector<2x8x8xf32> to vector<2x8x8xbf16>
    "tpu.trace_start"() <{level = 10 : i32, message = "bnm,bmd->bnd"}> : () -> ()
    %cst_24 = arith.constant dense<0.000000e+00> : vector<2x8x16xf32>
    %84 = tpu.matmul %83, %71, %cst_24 {dimension_numbers = #tpu.dot_dimension_numbers<[2], [1], [1], [2], [0, 0, 0, 1, 1, 2], [0], [0]>} : vector<2x8x8xbf16>, vector<2x8x16xbf16>, vector<2x8x16xf32> -> vector<2x8x16xf32>
    "tpu.trace_stop"() : () -> ()
    %85 = vector.extract_strided_slice %27 {offsets = [0, 0, 144], sizes = [2, 8, 16], strides = [1, 1, 1]} : vector<2x8x192xf32> to vector<2x8x16xf32>
    %86 = arith.truncf %85 : vector<2x8x16xf32> to vector<2x8x16xbf16>
    %87 = vector.extract_strided_slice %27 {offsets = [0, 0, 160], sizes = [2, 8, 16], strides = [1, 1, 1]} : vector<2x8x192xf32> to vector<2x8x16xf32>
    %88 = arith.truncf %87 : vector<2x8x16xf32> to vector<2x8x16xbf16>
    %89 = vector.extract_strided_slice %27 {offsets = [0, 0, 176], sizes = [2, 8, 16], strides = [1, 1, 1]} : vector<2x8x192xf32> to vector<2x8x16xf32>
    %90 = arith.truncf %89 : vector<2x8x16xf32> to vector<2x8x16xbf16>
    "tpu.trace_start"() <{level = 10 : i32, message = "bnd,bmd->bnm"}> : () -> ()
    %cst_25 = arith.constant dense<0.000000e+00> : vector<2x8x8xf32>
    %91 = tpu.matmul %86, %88, %cst_25 {dimension_numbers = #tpu.dot_dimension_numbers<[2], [2], [1], [1], [0, 0, 0, 1, 1, 1], [0], [0]>} : vector<2x8x16xbf16>, vector<2x8x16xbf16>, vector<2x8x8xf32> -> vector<2x8x8xf32>
    "tpu.trace_stop"() : () -> ()
    %cst_26 = arith.constant dense<0xFF800000> : vector<2x8xf32>
    %92 = vector.multi_reduction <maximumf>, %91, %cst_26 [2] : vector<2x8x8xf32> to vector<2x8xf32>
    %93 = vector.shape_cast %92 : vector<2x8xf32> to vector<2x8x1xf32>
    %94 = vector.broadcast %93 : vector<2x8x1xf32> to vector<2x8x8xf32>
    %95 = arith.subf %91, %94 : vector<2x8x8xf32>
    %96 = math.exp %95 : vector<2x8x8xf32>
    %cst_27 = arith.constant dense<0.000000e+00> : vector<2x8xf32>
    %97 = vector.multi_reduction <add>, %96, %cst_27 [2] : vector<2x8x8xf32> to vector<2x8xf32>
    %98 = vector.shape_cast %97 : vector<2x8xf32> to vector<2x8x1xf32>
    %99 = tpu.reciprocal %98 : vector<2x8x1xf32> -> vector<2x8x1xf32>
    %100 = vector.broadcast %99 : vector<2x8x1xf32> to vector<2x8x8xf32>
    %101 = arith.mulf %96, %100 : vector<2x8x8xf32>
    %102 = arith.truncf %101 : vector<2x8x8xf32> to vector<2x8x8xbf16>
    "tpu.trace_start"() <{level = 10 : i32, message = "bnm,bmd->bnd"}> : () -> ()
    %cst_28 = arith.constant dense<0.000000e+00> : vector<2x8x16xf32>
    %103 = tpu.matmul %102, %90, %cst_28 {dimension_numbers = #tpu.dot_dimension_numbers<[2], [1], [1], [2], [0, 0, 0, 1, 1, 2], [0], [0]>} : vector<2x8x8xbf16>, vector<2x8x16xbf16>, vector<2x8x16xf32> -> vector<2x8x16xf32>
    "tpu.trace_stop"() : () -> ()
    %104 = tpu.concatenate %44, %63, %82, %101 in 2 : vector<2x8x8xf32>, vector<2x8x8xf32>, vector<2x8x8xf32>, vector<2x8x8xf32> -> vector<2x8x32xf32>
    %c0_29 = arith.constant 0 : index
    %c0_30 = arith.constant 0 : index
    %c0_31 = arith.constant 0 : index
    %105 = vector.load %arg8[%c0_29, %c0_30, %c0_31] : memref<2x8x32xf32, #tpu.memory_space<vmem>>, vector<2x8x32xf32>
    tpu.vector_store %arg8[%c0_29, %c0_30, %c0_31], %104 {strides = array<i32>} : memref<2x8x32xf32, #tpu.memory_space<vmem>>, vector<2x8x32xf32>,
    %106 = tpu.concatenate %46, %65, %84, %103 in 2 : vector<2x8x16xf32>, vector<2x8x16xf32>, vector<2x8x16xf32>, vector<2x8x16xf32> -> vector<2x8x64xf32>
    %107 = vector.shape_cast %106 : vector<2x8x64xf32> to vector<16x64xf32>
    %108 = arith.truncf %107 : vector<16x64xf32> to vector<16x64xbf16>
    %c0_32 = arith.constant 0 : index
    %c0_33 = arith.constant 0 : index
    %109 = vector.load %arg5[%c0_32, %c0_33] : memref<64x32xbf16, #tpu.memory_space<vmem>>, vector<64x32xbf16>
    %cst_34 = arith.constant dense<0.000000e+00> : vector<16x32xf32>
    %110 = tpu.matmul %108, %109, %cst_34 {dimension_numbers = #tpu.dot_dimension_numbers<[1], [0], [0], [1], [0, 0, 1, 1], [], []>} : vector<16x64xbf16>, vector<64x32xbf16>, vector<16x32xf32> -> vector<16x32xf32>
    %c0_35 = arith.constant 0 : index
    %c0_36 = arith.constant 0 : index
    %111 = vector.load %arg6[%c0_35, %c0_36] : memref<1x32xf32, #tpu.memory_space<vmem>>, vector<1x32xf32>
    %112 = vector.broadcast %111 : vector<1x32xf32> to vector<16x32xf32>
    %113 = arith.addf %110, %112 : vector<16x32xf32>
    %114 = vector.shape_cast %113 : vector<16x32xf32> to vector<2x8x32xf32>
    %c0_37 = arith.constant 0 : index
    %c0_38 = arith.constant 0 : index
    %c0_39 = arith.constant 0 : index
    %115 = vector.load %arg7[%c0_37, %c0_38, %c0_39] : memref<2x8x32xf32, #tpu.memory_space<vmem>>, vector<2x8x32xf32>
    tpu.vector_store %arg7[%c0_37, %c0_38, %c0_39], %114 {strides = array<i32>} : memref<2x8x32xf32, #tpu.memory_space<vmem>>, vector<2x8x32xf32>,
    return
  }
  func.func @transform_0(%arg0: i32) -> (i32, i32, i32) {
    %c0_i32 = arith.constant 0 : i32
    %c0_i32_0 = arith.constant 0 : i32
    %c0_i32_1 = arith.constant 0 : i32
    return %arg0, %c0_i32, %c0_i32_0 : i32, i32, i32
  }
  func.func @transform_1(%arg0: i32) -> (i32, i32) {
    %c0_i32 = arith.constant 0 : i32
    %c0_i32_0 = arith.constant 0 : i32
    %c0_i32_1 = arith.constant 0 : i32
    return %c0_i32, %c0_i32_0 : i32, i32
  }
  func.func @transform_2(%arg0: i32) -> (i32, i32) {
    %c0_i32 = arith.constant 0 : i32
    %c0_i32_0 = arith.constant 0 : i32
    %c0_i32_1 = arith.constant 0 : i32
    return %c0_i32, %c0_i32_0 : i32, i32
  }
  func.func @transform_3(%arg0: i32) -> (i32, i32) {
    %c0_i32 = arith.constant 0 : i32
    %c0_i32_0 = arith.constant 0 : i32
    %c0_i32_1 = arith.constant 0 : i32
    return %c0_i32, %c0_i32_0 : i32, i32
  }
  func.func @transform_4(%arg0: i32) -> (i32, i32) {
    %c0_i32 = arith.constant 0 : i32
    %c0_i32_0 = arith.constant 0 : i32
    %c0_i32_1 = arith.constant 0 : i32
    return %c0_i32, %c0_i32_0 : i32, i32
  }
  func.func @transform_5(%arg0: i32) -> (i32, i32) {
    %c0_i32 = arith.constant 0 : i32
    %c0_i32_0 = arith.constant 0 : i32
    %c0_i32_1 = arith.constant 0 : i32
    return %c0_i32, %c0_i32_0 : i32, i32
  }
  func.func @transform_6(%arg0: i32) -> (i32, i32, i32) {
    %c0_i32 = arith.constant 0 : i32
    %c0_i32_0 = arith.constant 0 : i32
    %c0_i32_1 = arith.constant 0 : i32
    return %arg0, %c0_i32, %c0_i32_0 : i32, i32, i32
  }
  func.func @transform_7(%arg0: i32) -> (i32, i32, i32) {
    %c0_i32 = arith.constant 0 : i32
    %c0_i32_0 = arith.constant 0 : i32
    %c0_i32_1 = arith.constant 0 : i32
    return %arg0, %c0_i32, %c0_i32_0 : i32, i32, i32
  }
}

</mosaic_0001>

<bundles_post_ra>
// kernel: tpu_custom_call.1
= control target key start
LH: loop header
LB: loop body
LE: loop exit
PB: predicated region body
PF: predicated region fallthrough
CT: control target
= control target key end

     0   :  { %13 = vsyncpa [#allocation3], 0  ;;  %vm30_vm0 = vcmask 261120   ;;  %s1859_s0 = inlined_call_operand.vmem [shape: f32[2,8,32], index: 0, kind: input, shape index: {}]   ;;  %s1860_s1 = inlined_call_operand.vmem [shape: f32[1,32], index: 1, kind: input, shape index: {}]   ;;  %s1861_s2 = inlined_call_operand.vmem [shape: f32[1,32], index: 2, kind: input, shape index: {}]   ;;  %s1862_s3 = inlined_call_operand.vmem [shape: bf16[32,192], index: 3, kind: input, shape index: {}]   ;;  %s1863_s4 = inlined_call_operand.vmem [shape: bf16[64,32], index: 4, kind: input, shape index: {}]   ;;  %s1864_s5 = inlined_call_operand.vmem [shape: f32[1,32], index: 5, kind: input, shape index: {}]   ;;  %s1865_s6 = inlined_call_operand.hbm [shape: f32[2,8,32], index: 6, kind: output, shape index: {0}]   ;;  %s1866_s7 = inlined_call_operand.hbm [shape: f32[2,8,32], index: 7, kind: output, shape index: {1}]  }
   0x1   :  { %v28_v0 = vld [vmem:[%s1859_s0] sm:$0xff]  ;;  %v29_v1 = vld [vmem:[%s1859_s0 + $0x8] sm:$0xff] }
   0x2   :  { %v31_v2 = vsel %vm30_vm0, %v28_v0, 0.0  ;;  %v34_v3 = vsel %vm30_vm0, %v29_v1, 0.0 }
   0x3   :  { %32 = vadd.xlane.f32.xlu0 %v31_v2 }
   0x4   :  { %14 = vsyncpa [#allocation5], 0  ;;  %v1417_v14 = vld [vmem:[%s1862_s3 + $0x4] ss:$8 sps:$4 sm:$0xff]   ;;  %v1419_v15 = vld [vmem:[%s1862_s3] ss:$8 sps:$4 sm:$0xff]  }
   0x5   :  { %104 = vmatprep.subr.bf16.mxu0 %v1417_v14  ;;  %v1420_v16 = vld [vmem:[%s1862_s3 + $0x14] ss:$8 sps:$4 sm:$0xff]   ;;  %v1422_v17 = vld [vmem:[%s1862_s3 + $0x10] ss:$8 sps:$4 sm:$0xff]   ;;  %v1511_v18 = vmov 0   ;;  %v1512_v36 = vmov 0.0  }
   0x6   :  { %105 = vmatpush1.bf16.msra.mxu0 %v1419_v15  ;;  %136 = vmatprep.mubr.bf16.mxu0 %v1511_v18  ;;  %v1213_v27 = vld [vmem:[%s1860_s1] ss:$0 sm:$0xff]  ;;  %vm1513_vm1 = vmmov 0   ;;  %s1514_s1 = smov 112   ;;  %vm152_vm2 = vcmask 130048   ;;  %vm248_vm3 = vcmask 64512  }
   0x7   :  { %35 = vadd.xlane.f32.xlu0 %v34_v3  ;;  %106 = vmatprep.subr.bf16.mxu0 %v1420_v16  ;;  %v1214_v31 = vld [vmem:[%s1861_s2] ss:$0 sm:$0xff]  ;;  %s1515_s2 = smov 96   ;;  %s1516_s15 = smov 64   ;;  %vm278_vm4 = vcmask 1043456   ;;  %vm1058_vm5 = vcmask 195584  }
   0x8   :  { %1279 = vmatprep.subr.bf16.mxu1 %v1512_v36  ;;  %1281 = vmatprep.mubr.msk.bf16.mxu1 %vm1513_vm1, %v1512_v36  ;;  %s1517_s16 = smov 80   ;;  %s1518_s17 = smov 48   ;;  %vm1091_vm6 = vcmask 392192   ;;  %vm1134_vm7 = vcmask 523264  }
   0x9   :  { %s1519_s18 = smov 16   ;;  %s1520_s19 = smov 32  }
   0xa   :  { %107 = vmatpush1.bf16.msra.mxu0 %v1422_v17  ;;  %s1521_s20 = smov 8   ;;  %s1522_s21 = smov 24  }
   0xb   :  { %1285 = vmatprep.subr.bf16.mxu0 %v1512_v36 }
  0x90   :  { %v33_v4 = vpop.xlane.xlu0 %32 }
  0x91   :  { %v38_v5 = vmul.f32 0.03125, %v33_v4 }
  0x93   :  { %v40_v6 = vsub.f32 %v28_v0, %v38_v5 }
  0x94   :  { %v36_v7 = vpop.xlane.xlu0 %35 }
  0x95   :  { %v39_v8 = vmul.f32 0.03125, %v36_v7  ;;  %v42_v9 = vmul.f32 %v40_v6, %v40_v6 }
  0x97   :  { %v41_v10 = vsub.f32 %v29_v1, %v39_v8  ;;  %v44_v11 = vsel %vm30_vm0, %v42_v9, 0.0 }
  0x98   :  { %45 = vadd.xlane.f32.xlu1 %v44_v11 }
  0x99   :  { %v43_v12 = vmul.f32 %v41_v10, %v41_v10 }
  0x9b   :  { %v47_v13 = vsel %vm30_vm0, %v43_v12, 0.0 }
  0x9c   :  { %48 = vadd.xlane.f32.xlu1 %v47_v13 }
 0x125   :  { %v46_v19 = vpop.xlane.xlu1 %45 }
 0x126   :  { %v50_v20 = vmul.f32 0.03125, %v46_v19 }
 0x128   :  { %v52_v21 = vadd.f32 1e-05, %v50_v20 }
 0x129   :  { %v49_v22 = vpop.xlane.xlu1 %48 }
 0x12a   :  { %1427 = vrsqrt.f32 %v52_v21  ;;  %v51_v23 = vmul.f32 0.03125, %v49_v22 }
 0x12c   :  { %v53_v24 = vadd.f32 1e-05, %v51_v23 }
 0x12e   :  { %1429 = vrsqrt.f32 %v53_v24 }
 0x134   :  { %v1428_v25 = vpop.eup %1427 }
 0x135   :  { %v56_v26 = vmul.f32 %v1428_v25, %v40_v6 }
 0x137   :  { %v65_v30 = vmul.f32 %v1213_v27, %v56_v26 }
 0x138   :  { %v1430_v28 = vpop.eup %1429 }
 0x139   :  { %v57_v29 = vmul.f32 %v1430_v28, %v41_v10  ;;  %v74_v33 = vadd.f32 %v1214_v31, %v65_v30 }
 0x13b   :  { %v66_v32 = vmul.f32 %v1213_v27, %v57_v29 }
 0x13d   :  { %v75_v34 = vadd.f32 %v1214_v31, %v66_v32 }
 0x13f   :  { %v76_v35 = vpack.c.bf16 %v75_v34, %v74_v33 }
 0x141   :  { %1219 = vmatmul.mubr.msk.bf16.vlgmr.msra.gmra.mrb[0].mxu0 %vm30_vm0, %v76_v35 }
 0x142   :  { %1287 = vmatprep.mubr.msk.bf16.mxu0 %vm1513_vm1, %v1512_v36 }
 0x214   :  { %v138_v37 = vpop.f32.mrb[0].mxu0 }
 0x215   :  { %v1601_v38 = vpack.c.bf16 %v138_v37, %v138_v37  ;;  %v1603_v39 = vpop.f32.mrb[1].mxu0 }
 0x216   :  { %v142_v40 = vpop.f32.mrb[2].mxu0 }
 0x217   :  { %v1605_v41 = vpack.c.bf16 %v142_v40, %v142_v40  ;;  %150 = vrot.lane.b32.xlu0 %v1601_v38, %s1514_s1  ;;  %v1609_v42 = vpop.f32.mrb[3].mxu0 }
 0x219   :  { %200 = vrot.lane.b32.xlu1 %v1605_v41, %s1514_s1 }
 0x289   :  { %v151_v43 = vpop.permute.xlu0 %150 }
 0x28a   :  { %v157_v44 = vsel %vm152_vm2, %v151_v43, 0 }
 0x28b   :  { %1280 = vmatpush3.bf16.xpose.msra.mxu1 %v157_v44  ;;  %v201_v45 = vpop.permute.xlu1 %200 }
 0x28c   :  { %v206_v46 = vsel %vm152_vm2, %v201_v45, 0  ;;  %1291 = vmatprep.subr.bf16.mxu1 %v1512_v36 }
 0x28d   :  { %1286 = vmatpush3.bf16.xpose.msra.mxu0 %v206_v46 }
 0x28e   :  { %1297 = vmatprep.subr.bf16.mxu0 %v1512_v36 }
 0x292   :  { %1282 = vmatmul.mubr.msk.bf16.vlgmr.msra.gmra.mrb[0].mxu1 %vm152_vm2, %v1601_v38 }
 0x293   :  { %1293 = vmatprep.mubr.msk.bf16.mxu1 %vm1513_vm1, %v1512_v36 }
 0x294   :  { %1288 = vmatmul.mubr.msk.bf16.vlgmr.msra.gmra.mrb[4].mxu0 %vm152_vm2, %v1605_v41 }
 0x295   :  { %1299 = vmatprep.mubr.msk.bf16.mxu0 %vm1513_vm1, %v1512_v36 }
 0x365   :  { %v193_v47 = vpop.f32.mrb[0].mxu1 }
 0x366   :  { %v1283_v48 = vpop.f32.mrb[1].mxu1  ;;  %v249_v49 = vsel %vm248_vm3, %v193_v47, -inf }
 0x367   :  { %v196_v50 = vpop.f32.mrb[2].mxu1  ;;  %250 = vmax.xlane.f32.xlu1 %v249_v49  ;;  %v242_v51 = vpop.f32.mrb[4].mxu0 }
 0x368   :  { %v1284_v52 = vpop.f32.mrb[3].mxu1  ;;  %v1289_v53 = vpop.f32.mrb[5].mxu0  ;;  %v252_v54 = vsel %vm248_vm3, %v242_v51, -inf }
 0x369   :  { %253 = vmax.xlane.f32.xlu0 %v252_v54  ;;  %v245_v55 = vpop.f32.mrb[6].mxu0 }
 0x36a   :  { %v1290_v56 = vpop.f32.mrb[7].mxu0 }
 0x378   :  { %322 = vrot.lane.b32.xlu1 %v1605_v41, %s1515_s2 }
 0x37c   :  { %372 = vrot.lane.b32.xlu1 %v1601_v38, %s1516_s15 }
 0x3f4   :  { %v251_v57 = vpop.xlane.xlu1 %250 }
 0x3f5   :  { %v255_v58 = vsub.f32 %v193_v47, %v251_v57 }
 0x3f6   :  { %v254_v59 = vpop.xlane.xlu0 %253 }
 0x3f7   :  { %v257_v60 = vmul.f32 1.442695, %v255_v58  ;;  %v256_v61 = vsub.f32 %v242_v51, %v254_v59 }
 0x3f8   :  { %v323_v62 = vpop.permute.xlu1 %322 }
 0x3f9   :  { %1431 = vpow2.f32 %v257_v60  ;;  %v259_v63 = vmul.f32 1.442695, %v256_v61  ;;  %v328_v0 = vsel %vm278_vm4, %v323_v62, 0 }
 0x3fa   :  { %1298 = vmatpush3.bf16.msra.mxu0 %v328_v0 }
 0x3fb   :  { %1433 = vpow2.f32 %v259_v63  ;;  %1309 = vmatprep.subr.bf16.mxu0 %v1512_v36 }
 0x3fc   :  { %v373_v5 = vpop.permute.xlu1 %372 }
 0x3fd   :  { %v378_v16 = vsel %vm152_vm2, %v373_v5, 0  ;;  %v1715_v5 = vpack.c.bf16 %v1609_v42, %v1609_v42 }
 0x403   :  { %v1432_v1 = vpop.eup %1431 }
 0x404   :  { %v261_v2 = vsel %vm248_vm3, %v1432_v1, 0.0 }
 0x405   :  { %v1434_v3 = vpop.eup %1433  ;;  %262 = vadd.xlane.f32.xlu0 %v261_v2 }
 0x406   :  { %v264_v4 = vsel %vm248_vm3, %v1434_v3, 0.0 }
 0x407   :  { %265 = vadd.xlane.f32.xlu1 %v264_v4  ;;  %v1710_v4 = vpack.c.bf16 %v1603_v39, %v1603_v39  ;;  %v766_v39 = vsel %vm278_vm4, %v1715_v5, 0 }
 0x418   :  { %422 = vrot.lane.b32.xlu1 %v1605_v41, %s1516_s15 }
 0x41b   :  { %273 = vrot.lane.b32.xlu0 %v1601_v38, %s1515_s2 }
 0x41c   :  { %420 = vrot.lane.b32.xlu1 %v1605_v41, %s1517_s16 }
 0x41f   :  { %370 = vrot.lane.b32.xlu0 %v1601_v38, %s1517_s16 }
 0x492   :  { %v263_v6 = vpop.xlane.xlu0 %262 }
 0x493   :  { %1435 = vrcp.f32 %v263_v6 }
 0x494   :  { %v266_v7 = vpop.xlane.xlu1 %265 }
 0x495   :  { %1437 = vrcp.f32 %v266_v7  ;;  %v720_v7 = vsel %vm278_vm4, %v1710_v4, 0 }
 0x496   :  { %v274_v8 = vpop.permute.xlu0 %273 }
 0x497   :  { %v280_v9 = vsel %vm278_vm4, %v274_v8, 0 }
 0x498   :  { %1292 = vmatpush3.bf16.msra.mxu1 %v280_v9  ;;  %v423_v15 = vpop.permute.xlu1 %422 }
 0x499   :  { %1303 = vmatprep.subr.bf16.mxu1 %v1512_v36  ;;  %v428_v18 = vsel %vm152_vm2, %v423_v15, 0 }
 0x49a   :  { %v371_v19 = vpop.permute.xlu0 %370 }
 0x49c   :  { %v421_v20 = vpop.permute.xlu1 %420 }
 0x49d   :  { %v1436_v10 = vpop.eup %1435 }
 0x49e   :  { %v1643_v11 = vmul.f32 %v1436_v10, %v1432_v1 }
 0x49f   :  { %v1438_v12 = vpop.eup %1437 }
 0x4a0   :  { %v1645_v13 = vmul.f32 %v1438_v12, %v1434_v3  ;;  %v271_v14 = vpack.c.bf16 %v1643_v11, %v1643_v11 }
 0x4a2   :  { %1294 = vmatmul.mubr.msk.bf16.vlgmr.msra.gmra.mrb[4].mxu1 %vm248_vm3, %v271_v14  ;;  %v272_v17 = vpack.c.bf16 %v1645_v13, %v1645_v13 }
 0x4a3   :  { %1304 = vmatpush3.bf16.xpose.msra.mxu1 %v378_v16  ;;  %1305 = vmatprep.mubr.msk.bf16.mxu1 %vm1513_vm1, %v1512_v36 }
 0x4a4   :  { %1300 = vmatmul.mubr.msk.bf16.vlgmr.msra.gmra.mrb[8].mxu0 %vm248_vm3, %v272_v17  ;;  %1315 = vmatprep.subr.bf16.mxu1 %v1512_v36 }
 0x4a5   :  { %1310 = vmatpush3.bf16.xpose.msra.mxu0 %v428_v18  ;;  %1311 = vmatprep.mubr.msk.bf16.mxu0 %vm1513_vm1, %v1512_v36 }
 0x4a6   :  { %1321 = vmatprep.subr.bf16.mxu0 %v1512_v36 }
 0x4aa   :  { %1306 = vmatmul.mubr.msk.bf16.vlgmr.msra.gmra.mrb[8].mxu1 %vm152_vm2, %v371_v19 }
 0x4ab   :  { %1317 = vmatprep.mubr.msk.bf16.mxu1 %vm1513_vm1, %v1512_v36 }
 0x4ac   :  { %1312 = vmatmul.mubr.msk.bf16.vlgmr.msra.gmra.mrb[12].mxu0 %vm152_vm2, %v421_v20 }
 0x4ad   :  { %1323 = vmatprep.mubr.msk.bf16.mxu0 %vm1513_vm1, %v1512_v36 }
 0x575   :  { %v1667_v21 = vpop.f32.mrb[4].mxu1 }
 0x576   :  { %v1295_v22 = vpop.f32.mrb[5].mxu1 }
 0x577   :  { %v319_v23 = vpop.f32.mrb[6].mxu1  ;;  %v1669_v24 = vpop.f32.mrb[8].mxu0 }
 0x578   :  { %v1296_v25 = vpop.f32.mrb[7].mxu1  ;;  %v1301_v26 = vpop.f32.mrb[9].mxu0 }
 0x579   :  { %v367_v27 = vpop.f32.mrb[10].mxu0 }
 0x57a   :  { %v1302_v28 = vpop.f32.mrb[11].mxu0 }
 0x57d   :  { %v414_v29 = vpop.f32.mrb[8].mxu1 }
 0x57e   :  { %v1307_v30 = vpop.f32.mrb[9].mxu1  ;;  %v470_v31 = vsel %vm248_vm3, %v414_v29, -inf }
 0x57f   :  { %471 = vmax.xlane.f32.xlu0 %v470_v31  ;;  %v417_v32 = vpop.f32.mrb[10].mxu1  ;;  %v464_v33 = vpop.f32.mrb[12].mxu0 }
 0x580   :  { %v1308_v34 = vpop.f32.mrb[11].mxu1  ;;  %v1313_v35 = vpop.f32.mrb[13].mxu0  ;;  %v473_v37 = vsel %vm248_vm3, %v464_v33, -inf }
 0x581   :  { %474 = vmax.xlane.f32.xlu1 %v473_v37  ;;  %v467_v40 = vpop.f32.mrb[14].mxu0 }
 0x582   :  { %v1314_v43 = vpop.f32.mrb[15].mxu0 }
 0x592   :  { %542 = vrot.lane.b32.xlu1 %v1605_v41, %s1518_s17 }
 0x596   :  { %594 = vrot.lane.b32.xlu1 %v1601_v38, %s1519_s18 }
 0x59a   :  { %644 = vrot.lane.b32.xlu1 %v1605_v41, %s1519_s18 }
 0x59e   :  { %642 = vrot.lane.b32.xlu1 %v1605_v41, %s1520_s19 }
 0x60c   :  { %v472_v44 = vpop.xlane.xlu0 %471 }
 0x60d   :  { %v476_v45 = vsub.f32 %v414_v29, %v472_v44 }
 0x60e   :  { %v475_v46 = vpop.xlane.xlu1 %474 }
 0x60f   :  { %v478_v47 = vmul.f32 1.442695, %v476_v45  ;;  %v477_v48 = vsub.f32 %v464_v33, %v475_v46 }
 0x611   :  { %1439 = vpow2.f32 %v478_v47  ;;  %v480_v49 = vmul.f32 1.442695, %v477_v48 }
 0x612   :  { %v543_v50 = vpop.permute.xlu1 %542 }
 0x613   :  { %1441 = vpow2.f32 %v480_v49  ;;  %v548_v51 = vsel %vm278_vm4, %v543_v50, 0 }
 0x614   :  { %1322 = vmatpush3.bf16.msra.mxu0 %v548_v51 }
 0x615   :  { %1333 = vmatprep.subr.bf16.mxu0 %v1512_v36 }
 0x616   :  { %v595_v60 = vpop.permute.xlu1 %594 }
 0x617   :  { %v600_v1 = vsel %vm152_vm2, %v595_v60, 0 }
 0x61b   :  { %v1440_v52 = vpop.eup %1439 }
 0x61c   :  { %v482_v53 = vsel %vm248_vm3, %v1440_v52, 0.0 }
 0x61d   :  { %v1442_v54 = vpop.eup %1441  ;;  %483 = vadd.xlane.f32.xlu0 %v482_v53 }
 0x61e   :  { %v485_v41 = vsel %vm248_vm3, %v1442_v54, 0.0 }
 0x621   :  { %486 = vadd.xlane.f32.xlu0 %v485_v41 }
 0x637   :  { %494 = vrot.lane.b32.xlu0 %v1601_v38, %s1518_s17 }
 0x63b   :  { %592 = vrot.lane.b32.xlu0 %v1601_v38, %s1520_s19  ;;  %v645_v38 = vpop.permute.xlu1 %644 }
 0x63c   :  { %v650_v3 = vsel %vm152_vm2, %v645_v38, 0 }
 0x63f   :  { %v643_v8 = vpop.permute.xlu1 %642 }
 0x6aa   :  { %v484_v55 = vpop.xlane.xlu0 %483 }
 0x6ab   :  { %1443 = vrcp.f32 %v484_v55 }
 0x6ae   :  { %v487_v56 = vpop.xlane.xlu0 %486 }
 0x6af   :  { %1445 = vrcp.f32 %v487_v56 }
 0x6b2   :  { %v495_v57 = vpop.permute.xlu0 %494 }
 0x6b3   :  { %v500_v58 = vsel %vm278_vm4, %v495_v57, 0 }
 0x6b4   :  { %1316 = vmatpush3.bf16.msra.mxu1 %v500_v58 }
 0x6b5   :  { %v1444_v59 = vpop.eup %1443  ;;  %1327 = vmatprep.subr.bf16.mxu1 %v1512_v36 }
 0x6b6   :  { %v1691_v61 = vmul.f32 %v1444_v59, %v1440_v52  ;;  %v593_v6 = vpop.permute.xlu0 %592 }
 0x6b8   :  { %v492_v62 = vpack.c.bf16 %v1691_v61, %v1691_v61 }
 0x6b9   :  { %v1446_v63 = vpop.eup %1445 }
 0x6ba   :  { %v1695_v0 = vmul.f32 %v1446_v63, %v1442_v54  ;;  %1318 = vmatmul.mubr.msk.bf16.vlgmr.msra.gmra.mrb[12].mxu1 %vm248_vm3, %v492_v62 }
 0x6bb   :  { %1329 = vmatprep.mubr.msk.bf16.mxu1 %vm1513_vm1, %v1512_v36 }
 0x6bc   :  { %v493_v2 = vpack.c.bf16 %v1695_v0, %v1695_v0 }
 0x6bd   :  { %1328 = vmatpush3.bf16.xpose.msra.mxu1 %v600_v1 }
 0x6be   :  { %1324 = vmatmul.mubr.msk.bf16.vlgmr.msra.gmra.mrb[16].mxu0 %vm248_vm3, %v493_v2  ;;  %1339 = vmatprep.subr.bf16.mxu1 %v1512_v36 }
 0x6bf   :  { %1334 = vmatpush3.bf16.xpose.msra.mxu0 %v650_v3  ;;  %1335 = vmatprep.mubr.msk.bf16.mxu0 %vm1513_vm1, %v1512_v36 }
 0x6c0   :  { %1345 = vmatprep.subr.bf16.mxu0 %v1512_v36 }
 0x6c4   :  { %1330 = vmatmul.mubr.msk.bf16.vlgmr.msra.gmra.mrb[16].mxu1 %vm152_vm2, %v593_v6 }
 0x6c5   :  { %1340 = vmatpush3.bf16.msra.mxu1 %v720_v7  ;;  %1341 = vmatprep.mubr.msk.bf16.mxu1 %vm1513_vm1, %v1512_v36 }
 0x6c6   :  { %1336 = vmatmul.mubr.msk.bf16.vlgmr.msra.gmra.mrb[20].mxu0 %vm152_vm2, %v643_v8  ;;  %1351 = vmatprep.subr.bf16.mxu1 %v1512_v36 }
 0x6c7   :  { %1346 = vmatpush3.bf16.msra.mxu0 %v766_v39  ;;  %1347 = vmatprep.mubr.msk.bf16.mxu0 %vm1513_vm1, %v1512_v36 }
 0x6c8   :  { %1357 = vmatprep.subr.bf16.mxu0 %v1512_v36 }
 0x78d   :  { %v1729_v42 = vpop.f32.mrb[12].mxu1 }
 0x78e   :  { %v1319_v9 = vpop.f32.mrb[13].mxu1 }
 0x78f   :  { %v539_v10 = vpop.f32.mrb[14].mxu1 }
 0x790   :  { %v1320_v12 = vpop.f32.mrb[15].mxu1 }
 0x791   :  { %v1731_v14 = vpop.f32.mrb[16].mxu0 }
 0x792   :  { %v1402_v15 = vpack.i.bf16 %v1731_v14, %v1729_v42  ;;  %v1325_v16 = vpop.f32.mrb[17].mxu0 }
 0x793   :  { %v587_v17 = vpop.f32.mrb[18].mxu0 }
 0x794   :  { %v1326_v18 = vpop.f32.mrb[19].mxu0 }
 0x797   :  { %v636_v19 = vpop.f32.mrb[16].mxu1 }
 0x798   :  { %v1331_v20 = vpop.f32.mrb[17].mxu1  ;;  %v692_v22 = vsel %vm248_vm3, %v636_v19, -inf }
 0x799   :  { %693 = vmax.xlane.f32.xlu0 %v692_v22  ;;  %v639_v23 = vpop.f32.mrb[18].mxu1  ;;  %v686_v25 = vpop.f32.mrb[20].mxu0 }
 0x79a   :  { %v1332_v26 = vpop.f32.mrb[19].mxu1  ;;  %v1337_v27 = vpop.f32.mrb[21].mxu0  ;;  %v695_v28 = vsel %vm248_vm3, %v686_v25, -inf }
 0x79b   :  { %696 = vmax.xlane.f32.xlu1 %v695_v28  ;;  %v689_v29 = vpop.f32.mrb[22].mxu0 }
 0x79c   :  { %v1338_v30 = vpop.f32.mrb[23].mxu0 }
 0x7ac   :  { %862 = vrot.lane.b32.xlu1 %v1715_v5, %s1515_s2 }
 0x7b0   :  { %809 = vrot.lane.b32.xlu1 %v1710_v4, %s1514_s1 }
 0x7b4   :  { %860 = vrot.lane.b32.xlu1 %v1715_v5, %s1514_s1 }
 0x826   :  { %v694_v31 = vpop.xlane.xlu0 %693 }
 0x827   :  { %v698_v32 = vsub.f32 %v636_v19, %v694_v31 }
 0x828   :  { %v697_v33 = vpop.xlane.xlu1 %696 }
 0x829   :  { %v700_v34 = vmul.f32 1.442695, %v698_v32  ;;  %v699_v35 = vsub.f32 %v686_v25, %v697_v33 }
 0x82b   :  { %1447 = vpow2.f32 %v700_v34  ;;  %v702_v37 = vmul.f32 1.442695, %v699_v35 }
 0x82c   :  { %v863_v53 = vpop.permute.xlu1 %862 }
 0x82d   :  { %1449 = vpow2.f32 %v702_v37  ;;  %v868_v56 = vsel %vm152_vm2, %v863_v53, 0  ;;  %v1424_v53 = vld [vmem:[%s1863_s4 + $0x8] sm:$0xff]  }
 0x830   :  { %v810_v57 = vpop.permute.xlu1 %809 }
 0x834   :  { %v861_v58 = vpop.permute.xlu1 %860 }
 0x835   :  { %v1448_v40 = vpop.eup %1447 }
 0x836   :  { %v704_v43 = vsel %vm248_vm3, %v1448_v40, 0.0 }
 0x837   :  { %v1450_v44 = vpop.eup %1449  ;;  %705 = vadd.xlane.f32.xlu0 %v704_v43 }
 0x838   :  { %v707_v45 = vsel %vm248_vm3, %v1450_v44, 0.0 }
 0x83b   :  { %708 = vadd.xlane.f32.xlu0 %v707_v45 }
 0x851   :  { %811 = vrot.lane.b32.xlu0 %v1710_v4, %s1515_s2 }
 0x8c4   :  { %v706_v46 = vpop.xlane.xlu0 %705 }
 0x8c5   :  { %1451 = vrcp.f32 %v706_v46 }
 0x8c8   :  { %v709_v47 = vpop.xlane.xlu0 %708 }
 0x8c9   :  { %1453 = vrcp.f32 %v709_v47 }
 0x8cc   :  { %v812_v50 = vpop.permute.xlu0 %811 }
 0x8cd   :  { %v817_v41 = vsel %vm152_vm2, %v812_v50, 0 }
 0x8cf   :  { %v1452_v48 = vpop.eup %1451 }
 0x8d0   :  { %v712_v49 = vmul.f32 %v1452_v48, %v1448_v40 }
 0x8d2   :  { %v714_v51 = vpack.c.bf16 %v712_v49, %v712_v49 }
 0x8d3   :  { %v1454_v52 = vpop.eup %1453 }
 0x8d4   :  { %v1747_v54 = vmul.f32 %v1454_v52, %v1450_v44  ;;  %1342 = vmatmul.mubr.msk.bf16.vlgmr.msra.gmra.mrb[20].mxu1 %vm248_vm3, %v714_v51  ;;  %v1423_v52 = vld [vmem:[%s1863_s4] sm:$0xff]  }
 0x8d5   :  { %1352 = vmatpush3.bf16.xpose.msra.mxu1 %v817_v41  ;;  %1353 = vmatprep.mubr.msk.bf16.mxu1 %vm1513_vm1, %v1512_v36 }
 0x8d6   :  { %v715_v55 = vpack.c.bf16 %v1747_v54, %v1747_v54  ;;  %1363 = vmatprep.subr.bf16.mxu1 %v1512_v36 }
 0x8d8   :  { %1348 = vmatmul.mubr.msk.bf16.vlgmr.msra.gmra.mrb[24].mxu0 %vm248_vm3, %v715_v55  ;;  %v1425_v55 = vld [vmem:[%s1863_s4 + $0x10] sm:$0xff]  }
 0x8d9   :  { %1358 = vmatpush3.bf16.xpose.msra.mxu0 %v868_v56  ;;  %1359 = vmatprep.mubr.msk.bf16.mxu0 %vm1513_vm1, %v1512_v36 }
 0x8da   :  { %1369 = vmatprep.subr.bf16.mxu0 %v1512_v36 }
 0x8dc   :  { %1354 = vmatmul.mubr.msk.bf16.vlgmr.msra.gmra.mrb[24].mxu1 %vm152_vm2, %v810_v57 }
 0x8dd   :  { %1365 = vmatprep.mubr.msk.bf16.mxu1 %vm1513_vm1, %v1512_v36 }
 0x8e0   :  { %1360 = vmatmul.mubr.msk.bf16.vlgmr.msra.gmra.mrb[28].mxu0 %vm152_vm2, %v861_v58 }
 0x8e1   :  { %1371 = vmatprep.mubr.msk.bf16.mxu0 %vm1513_vm1, %v1512_v36 }
 0x9a7   :  { %v756_v59 = vpop.f32.mrb[20].mxu1 }
 0x9a8   :  { %v1343_v60 = vpop.f32.mrb[21].mxu1 }
 0x9a9   :  { %v759_v62 = vpop.f32.mrb[22].mxu1  ;;  %v1426_v60 = vld [vmem:[%s1863_s4 + $0x18] sm:$0xff]   ;;  %s1523_s4 = smov [#allocation4]  }
 0x9aa   :  { %v1344_v63 = vpop.f32.mrb[23].mxu1  ;;  %s1198_s29 = sshll.u32 %s1523_s4, 4  ;;  %s1199_s29 = int_to_ptr.vmem [resolvable:$true] %s1198_s29 }
 0x9ab   :  { %v802_v38 = vpop.f32.mrb[24].mxu0  ;;  %s1463_s30 = scalar_lea.vmem %s1199_s29, 256  ;;  %p1468_p1 = scmp.lt.s32.totalorder %s1199_s29, %s1199_s29 }
 0x9ac   :  { %v1407_v1 = vpack.i.bf16 %v802_v38, %v756_v59  ;;  %v1349_v2 = vpop.f32.mrb[25].mxu0  ;;  %p1464_p0 = scmp.ne.s32.totalorder %s1199_s29, %s1463_s30  ;;  %p1469_p2 = scmp.lt.s32.totalorder %s1463_s30, %s1463_s30 }
 0x9ad   :  { %v805_v3 = vpop.f32.mrb[26].mxu0 }
 0x9ae   :  { %v1350_v6 = vpop.f32.mrb[27].mxu0  ;;  %p1470_p3 = por %p1469_p2, %p1468_p1 }
 0x9af   :  { %v853_v7 = vpop.f32.mrb[24].mxu1 }
 0x9b0   :  { %v1355_v8 = vpop.f32.mrb[25].mxu1  ;;  %v910_v39 = vsel %vm248_vm3, %v853_v7, -inf  ;;  %p1471_p4 = pnand %p1470_p3, %p1464_p0 }
 0x9b1   :  { %911 = vmax.xlane.f32.xlu0 %v910_v39  ;;  %v856_v9 = vpop.f32.mrb[26].mxu1 }
 0x9b2   :  { %v1356_v10 = vpop.f32.mrb[27].mxu1 }
 0x9b3   :  { %v904_v12 = vpop.f32.mrb[28].mxu0 }
 0x9b4   :  { %v1361_v16 = vpop.f32.mrb[29].mxu0  ;;  %v913_v17 = vsel %vm248_vm3, %v904_v12, -inf }
 0x9b5   :  { %914 = vmax.xlane.f32.xlu1 %v913_v17  ;;  %v907_v18 = vpop.f32.mrb[30].mxu0 }
 0x9b6   :  { %v1362_v19 = vpop.f32.mrb[31].mxu0 }
 0x9c6   :  { %982 = vrot.lane.b32.xlu1 %v1715_v5, %s1517_s16 }
 0x9ca   :  { %1403 = vrot.lane.b32.xlu1 %v1402_v15, %s1519_s18 }
 0x9ce   :  { %1408 = vrot.lane.b32.xlu1 %v1407_v1, %s1520_s19 }
 0x9d2   :  { %1032 = vrot.lane.b32.xlu1 %v1691_v61, %s1521_s20 }
 0x9d6   :  { %1040 = vrot.lane.b32.xlu1 %v712_v49, %s1519_s18 }
 0xa3e   :  { %v912_v20 = vpop.xlane.xlu0 %911 }
 0xa3f   :  { %v916_v22 = vsub.f32 %v853_v7, %v912_v20 }
 0xa41   :  { %v918_v23 = vmul.f32 1.442695, %v916_v22 }
 0xa42   :  { %v915_v25 = vpop.xlane.xlu1 %914 }
 0xa43   :  { %1455 = vpow2.f32 %v918_v23  ;;  %v917_v26 = vsub.f32 %v904_v12, %v915_v25 }
 0xa45   :  { %v920_v5 = vmul.f32 1.442695, %v917_v26 }
 0xa46   :  { %v983_v27 = vpop.permute.xlu1 %982 }
 0xa47   :  { %1457 = vpow2.f32 %v920_v5  ;;  %v988_v42 = vsel %vm278_vm4, %v983_v27, 0 }
 0xa48   :  { %1370 = vmatpush3.bf16.msra.mxu0 %v988_v42 }
 0xa4a   :  { %v1404_v14 = vpop.permute.xlu1 %1403 }
 0xa4b   :  { %v1406_v15 = vunpack.i.h.bf16 %v1404_v14  ;;  %v1405_v28 = vunpack.i.l.bf16 %v1404_v14 }
 0xa4d   :  { %v1456_v29 = vpop.eup %1455  ;;  %v1088_v61 = vsel %vm152_vm2, %v1669_v24, %v1406_v15  ;;  %v1087_v30 = vsel %vm152_vm2, %v1667_v21, %v1405_v28 }
 0xa4e   :  { %v1409_v31 = vpop.permute.xlu1 %1408  ;;  %v922_v32 = vsel %vm248_vm3, %v1456_v29, 0.0 }
 0xa4f   :  { %v1411_v33 = vunpack.i.h.bf16 %v1409_v31  ;;  %v1410_v34 = vunpack.i.l.bf16 %v1409_v31  ;;  %923 = vadd.xlane.f32.xlu0 %v922_v32 }
 0xa51   :  { %v1458_v35 = vpop.eup %1457  ;;  %v1089_v37 = vsel %vm30_vm0, %v1087_v30, %v1410_v34  ;;  %v1090_v40 = vsel %vm30_vm0, %v1088_v61, %v1411_v33 }
 0xa52   :  { %v925_v43 = vsel %vm248_vm3, %v1458_v35, 0.0  ;;  %v1033_v51 = vpop.permute.xlu1 %1032 }
 0xa53   :  { %926 = vadd.xlane.f32.xlu0 %v925_v43  ;;  %v1054_v56 = vsel %vm248_vm3, %v1643_v11, %v1033_v51 }
 0xa56   :  { %v1041_v41 = vpop.permute.xlu1 %1040 }
 0xa57   :  { %v1056_v57 = vsel %vm152_vm2, %v1054_v56, %v1041_v41 }
 0xa69   :  { %934 = vrot.lane.b32.xlu0 %v1710_v4, %s1517_s16 }
 0xadc   :  { %v924_v24 = vpop.xlane.xlu0 %923 }
 0xadd   :  { %1459 = vrcp.f32 %v924_v24 }
 0xae0   :  { %v927_v21 = vpop.xlane.xlu0 %926 }
 0xae1   :  { %1461 = vrcp.f32 %v927_v21 }
 0xae4   :  { %v935_v44 = vpop.permute.xlu0 %934 }
 0xae5   :  { %v940_v45 = vsel %vm278_vm4, %v935_v44, 0 }
 0xae6   :  { %1364 = vmatpush3.bf16.msra.mxu1 %v940_v45 }
 0xae7   :  { %v1460_v46 = vpop.eup %1459  ;;  %1375 = vmatprep.subr.bf16.mxu1 %v1512_v36 }
 0xae8   :  { %v930_v47 = vmul.f32 %v1460_v46, %v1456_v29 }
 0xaea   :  { %v932_v48 = vpack.c.bf16 %v930_v47, %v930_v47  ;;  %1048 = vrot.lane.b32.xlu1 %v930_v47, %s1522_s21 }
 0xaeb   :  { %v1462_v49 = vpop.eup %1461 }
 0xaec   :  { %v931_v50 = vmul.f32 %v1462_v49, %v1458_v35  ;;  %1366 = vmatmul.mubr.msk.bf16.vlgmr.msra.gmra.mrb[28].mxu1 %vm248_vm3, %v932_v48 }
 0xaed   :  { %1383 = vmatprep.mubr.msk.bf16.mxu1 %vm1513_vm1, %v1512_v36  ;;  %1376 = vmatpush3.bf16.msra.mxu1 %v1423_v52 }
 0xaee   :  { %v933_v4 = vpack.c.bf16 %v931_v50, %v931_v50  ;;  %1377 = vmatprep.subr.bf16.mxu1 %v1512_v36 }
 0xaf0   :  { %1372 = vmatmul.mubr.msk.bf16.vlgmr.msra.gmra.mrb[32].mxu0 %vm248_vm3, %v933_v4 }
 0xaf1   :  { %1378 = vmatpush3.bf16.msra.mxu1 %v1424_v53 }
 0xaf2   :  { %1379 = vmatprep.subr.bf16.mxu1 %v1512_v36 }
 0xaf5   :  { %1380 = vmatpush3.bf16.msra.mxu1 %v1425_v55 }
 0xaf6   :  { %1381 = vmatprep.subr.bf16.mxu1 %v1512_v36 }
 0xaf9   :  { %1382 = vmatpush3.bf16.msra.mxu1 %v1426_v60 }
 0xb5c   :  { %v1049_v58 = vpop.permute.xlu1 %1048 }
 0xb5d   :  { %v1059_v59 = vsel %vm1058_vm5, %v1056_v57, %v1049_v58 }
 0xb5e   :  { %1061 = vst.msk [vmem:[#allocation4] sm:$0xff] %vm30_vm0, %v1059_v59 }
 0xbbf   :  { %v976_v62 = vpop.f32.mrb[28].mxu1 }
 0xbc0   :  { %v1367_v63 = vpop.f32.mrb[29].mxu1 }
 0xbc1   :  { %v979_v38 = vpop.f32.mrb[30].mxu1 }
 0xbc2   :  { %v1368_v1 = vpop.f32.mrb[31].mxu1 }
 0xbc3   :  { %v1024_v11 = vpop.f32.mrb[32].mxu0 }
 0xbc4   :  { %v1412_v2 = vpack.i.bf16 %v1024_v11, %v976_v62  ;;  %v1373_v3 = vpop.f32.mrb[33].mxu0 }
 0xbc5   :  { %v1027_v6 = vpop.f32.mrb[34].mxu0 }
 0xbc6   :  { %1413 = vrot.lane.b32.xlu0 %v1412_v2, %s1518_s17  ;;  %v1374_v7 = vpop.f32.mrb[35].mxu0 }
 0xbca   :  { %1034 = vrot.lane.b32.xlu0 %v1695_v0, %s1521_s20 }
 0xbce   :  { %1042 = vrot.lane.b32.xlu0 %v1747_v54, %s1519_s18 }
 0xbd2   :  { %1050 = vrot.lane.b32.xlu0 %v931_v50, %s1522_s21 }
 0xc38   :  { %v1414_v36 = vpop.permute.xlu0 %1413 }
 0xc39   :  { %v1416_v8 = vunpack.i.h.bf16 %v1414_v36  ;;  %v1415_v39 = vunpack.i.l.bf16 %v1414_v36 }
 0xc3b   :  { %v1093_v9 = vsel %vm1091_vm6, %v1090_v40, %v1416_v8  ;;  %v1092_v10 = vsel %vm1091_vm6, %v1089_v37, %v1415_v39 }
 0xc3c   :  { %v1094_v12 = vpack.c.bf16 %v1093_v9, %v1092_v10  ;;  %v1035_v16 = vpop.permute.xlu0 %1034 }
 0xc3d   :  { %v1055_v18 = vsel %vm248_vm3, %v1645_v13, %v1035_v16 }
 0xc3e   :  { %1384 = vmatmul.mubr.msk.bf16.vlgmr.msra.gmra.mrb[32].mxu1 %vm1134_vm7, %v1094_v12 }
 0xc40   :  { %v1043_v17 = vpop.permute.xlu0 %1042 }
 0xc41   :  { %v1057_v0 = vsel %vm152_vm2, %v1055_v18, %v1043_v17 }
 0xc44   :  { %v1051_v19 = vpop.permute.xlu0 %1050 }
 0xc45   :  { %v1060_v54 = vsel %vm1058_vm5, %v1057_v0, %v1051_v19 }
 0xc46   :  { %1062 = vst.msk [vmem:[#allocation4 + $0x8] sm:$0xff] %vm30_vm0, %v1060_v54 }
 0xc47   :  { %1474 = shalt.err (!%p1471_p4)
}
 0xc48   :  { %s1475_s10 = scalar_lea.hbm %s1866_s7, 256 }
 0xc49   :  { %p1476_p5 = scmp.ne.s32.totalorder %s1866_s7, %s1475_s10  ;;  %p1479_p6 = scmp.lt.u32.totalorder %s1475_s10, %s1866_s7 }
 0xc4b   :  { %p1481_p7 = pnand %p1479_p6, %p1476_p5 }
 0xc4d   :  { %1484 = shalt.err (!%p1481_p7)
}
 0xc4e   :  { %s1524_s14 = smov 128   ;;  %v1236_v13 = vld [vmem:[%s1864_s5] ss:$0 sm:$0xff]  ;;  %s1525_s17 = smov [#allocation2]  }
 0xc4f   :  { %1204 = dma.vmem_to_hbm [thread:$0]  %s1199_s29, 256, %s1866_s7, [#allocation5], %s1524_s14, %s1524_s14, %s1521_s20  }
 0xc50   :  { %s1186_s18 = sshll.u32 %s1525_s17, 4  ;;  %s1187_s18 = int_to_ptr.vmem [resolvable:$true] %s1186_s18 }
 0xc51   :  { %s1485_s19 = scalar_lea.vmem %s1187_s18, 256  ;;  %p1490_p9 = scmp.lt.s32.totalorder %s1187_s18, %s1187_s18 }
 0xc52   :  { %p1486_p8 = scmp.ne.s32.totalorder %s1187_s18, %s1485_s19  ;;  %p1491_p10 = scmp.lt.s32.totalorder %s1485_s19, %s1485_s19 }
 0xc54   :  { %p1492_p11 = por %p1491_p10, %p1490_p9 }
 0xc56   :  { %p1493_p12 = pnand %p1492_p11, %p1486_p8 }
 0xd11   :  { %v1172_v20 = vpop.f32.mrb[32].mxu1 }
 0xd12   :  { %v1173_v22 = vadd.f32 %v1236_v13, %v1172_v20  ;;  %v1385_v23 = vpop.f32.mrb[33].mxu1 }
 0xd13   :  { %v1175_v25 = vpop.f32.mrb[34].mxu1 }
 0xd14   :  { %1179 = vst.msk [vmem:[#allocation2] sm:$0xff] %vm30_vm0, %v1173_v22  ;;  %v1176_v26 = vadd.f32 %v1236_v13, %v1175_v25  ;;  %v1386_v5 = vpop.f32.mrb[35].mxu1 }
 0xd16   :  { %1180 = vst.msk [vmem:[#allocation2 + $0x8] sm:$0xff] %vm30_vm0, %v1176_v26 }
 0xd17   :  { %1496 = shalt.err (!%p1493_p12)
}
 0xd18   :  { %s1497_s21 = scalar_lea.hbm %s1865_s6, 256 }
 0xd19   :  { %p1498_p13 = scmp.ne.s32.totalorder %s1865_s6, %s1497_s21  ;;  %p1501_p0 = scmp.lt.u32.totalorder %s1497_s21, %s1865_s6 }
 0xd1b   :  { %p1503_p1 = pnand %p1501_p0, %p1498_p13 }
 0xd1d   :  { %1506 = shalt.err (!%p1503_p1)
}
 0xd1e   :  { %1192 = dma.vmem_to_hbm [thread:$0]  %s1187_s18, 256, %s1865_s6, [#allocation3], %s1524_s14, %s1524_s14, %s1521_s20  }
 0xd1f   :  { %1507 = dma.done.wait [#allocation3], 256  }
 0xd20   :  { %1508 = vsyncadd [#allocation3], 4294967040 }
 0xd21   :  { %1509 = dma.done.wait [#allocation5], 256  }
 0xd22   :  { %1510 = vsyncadd [#allocation5], 4294967040 }
 0xd23   :  { %1211 = vsyncpa [#allocation3], 1 }
 0xd24   :  { %1212 = vsyncpa [#allocation5], 1 }

</bundles_post_ra>
